<compile_context>
chip_gen: v7x
topology: tpu7x:2x2x1
jax: 0.10.0
libtpu: 0.0.40
codegen_flags: <defaults>
</compile_context>

<pallas_src>
import jax
import jax.numpy as jnp
from jax.experimental import pallas as pl
from jax.experimental.pallas import tpu as pltpu


def simple_nn_kernel(x_ref, w1_ref, b1_ref, w2_ref, b2_ref, o_ref):
    # fc1 on the MXU: (TB, D_in) @ (D_in, H) -> (TB, H), f32 accumulation.
    h = jnp.dot(x_ref[...], w1_ref[...], preferred_element_type=jnp.float32)
    h = jnp.maximum(h + b1_ref[...], 0.0)            # (1, H) bias broadcasts over sublanes; ReLU
    # fc2 (out_features == 1): VPU multiply + lane reduce; an MXU pass with N=1
    # would be >97% padding, and the kernel is HBM-bound anyway.
    logit = jnp.sum(h * w2_ref[...], axis=-1, keepdims=True) + b2_ref[...]   # (TB, 1)
    # sigmoid = 1 / (1 + exp(-x)); exp and approx reciprocal both ride the EUP slot.
    o_ref[...] = pl.reciprocal(1.0 + jnp.exp(-logit), approx=True).astype(o_ref.dtype)


def _pick_batch_tile(batch: int) -> int:
    """Batch (sublane-axis) tile: 128..512, >=2 grid steps once B > 128."""
    if batch <= 128:
        return batch                      # single full-extent block (always legal)
    half = (batch // 2) // 128 * 128      # guarantee >=2 steps for v7x's 2 TCs
    return min(512, max(128, half))       # mem-bound sweet spot: 512


def simple_nn_forward(x, w1, b1, w2, b2):
    """x: (B, D_in); w1: (D_in, H); b1: (H,); w2: (H, 1); b2: (1,). Returns (B, 1) f32."""
    B, D_in = x.shape
    H = w1.shape[1]

    # Stream the dominant x read (and tiny w1) as bf16; keep biases / w2 / all
    # post-matmul math in f32.
    x_bf = x.astype(jnp.bfloat16)                 # (B, D_in)  natural layout, no transpose
    w1_bf = w1.astype(jnp.bfloat16)               # (D_in, H)
    b1r = b1.reshape(1, H).astype(jnp.float32)    # (1, H) row, broadcasts over sublanes
    w2r = w2.reshape(1, H).astype(jnp.float32)    # (1, H) row
    b2r = b2.reshape(1, 1).astype(jnp.float32)    # (1, 1)

    TB = _pick_batch_tile(B)
    grid = (pl.cdiv(B, TB),)                      # ragged last block padded by Pallas

    cost = pl.CostEstimate(
        flops=2 * B * D_in * H + 3 * B * H + 2 * B,
        transcendentals=2 * B,                    # exp + reciprocal per output element
        bytes_accessed=2 * (B * D_in + D_in * H) + 4 * (2 * H + 1 + B),
    )

    out = pl.pallas_call(
        simple_nn_kernel,
        out_shape=jax.ShapeDtypeStruct((B, 1), jnp.float32),
        grid=grid,
        in_specs=[
            pl.BlockSpec((TB, D_in), lambda i: (i, 0)),   # x tile streams per grid step
            pl.BlockSpec((D_in, H), lambda i: (0, 0)),    # weights stay VMEM-resident
            pl.BlockSpec((1, H), lambda i: (0, 0)),
            pl.BlockSpec((1, H), lambda i: (0, 0)),
            pl.BlockSpec((1, 1), lambda i: (0, 0)),
        ],
        out_specs=pl.BlockSpec((TB, 1), lambda i: (i, 0)),
        compiler_params=pltpu.CompilerParams(
            dimension_semantics=("parallel",),            # shard batch tiles across TCs on v7x
        ),
        cost_estimate=cost,
    )(x_bf, w1_bf, b1r, w2r, b2r)

    return out


def reference_forward(x, w1, b1, w2, b2):
    h = jnp.maximum(x @ w1 + b1, 0.0)
    return jax.nn.sigmoid(h @ w2 + b2)


if __name__ == "__main__":
    input_size = 16
    hidden_size = 32

    key = jax.random.PRNGKey(0)
    kx, kw1, kb1, kw2, kb2 = jax.random.split(key, 5)

    # Deterministic init mimicking nn.Linear's uniform(-1/sqrt(fan_in), 1/sqrt(fan_in))
    bound1 = 1.0 / jnp.sqrt(float(input_size))
    w1 = jax.random.uniform(kw1, (input_size, hidden_size), jnp.float32, -bound1, bound1)
    b1 = jax.random.uniform(kb1, (hidden_size,), jnp.float32, -bound1, bound1)

    bound2 = 1.0 / jnp.sqrt(float(hidden_size))
    w2 = jax.random.uniform(kw2, (hidden_size, 1), jnp.float32, -bound2, bound2)
    b2 = jax.random.uniform(kb2, (1,), jnp.float32, -bound2, bound2)

    # Tolerance accounts for the bf16 x/w1 stream plus the EUP approximate
    # reciprocal in the sigmoid (~2^-12 relative).
    tol = 3e-3

    # Small batch (single block) — matches the module's typical use.
    batch = 8
    x = jax.random.normal(kx, (batch, input_size), dtype=jnp.float32)
    y = simple_nn_forward(x, w1, b1, w2, b2)
    jax.block_until_ready(y)
    y_ref = reference_forward(x, w1, b1, w2, b2)
    assert y.shape == (batch, 1)
    assert jnp.allclose(y, y_ref, atol=tol, rtol=tol), float(jnp.max(jnp.abs(y - y_ref)))

    # Larger, non-multiple-of-128 batch — exercises the cdiv grid / ragged last block.
    batch2 = 300
    x2 = jax.random.normal(kx, (batch2, input_size), dtype=jnp.float32)
    y2 = simple_nn_forward(x2, w1, b1, w2, b2)
    jax.block_until_ready(y2)
    y2_ref = reference_forward(x2, w1, b1, w2, b2)
    assert y2.shape == (batch2, 1)
    assert jnp.allclose(y2, y2_ref, atol=tol, rtol=tol), float(jnp.max(jnp.abs(y2 - y2_ref)))

    print("KERNEL_OK")
</pallas_src>

<mosaic_0001>
module attributes {stable_mosaic.version = 11 : i64} {
  func.func @simple_nn_kernel(%arg0: i32, %arg1: memref<8x16xbf16, #tpu.memory_space<vmem>>, %arg2: memref<16x32xbf16, #tpu.memory_space<vmem>>, %arg3: memref<1x32xf32, #tpu.memory_space<vmem>>, %arg4: memref<1x32xf32, #tpu.memory_space<vmem>>, %arg5: memref<1x1xf32, #tpu.memory_space<vmem>>, %arg6: memref<8x1xf32, #tpu.memory_space<vmem>>) attributes {dimension_semantics = [#tpu.dimension_semantics<parallel>], iteration_bounds = array<i64: 1>, scalar_prefetch = 0 : i64, scratch_operands = 0 : i64, tpu.core_type = #tpu.core_type<tc>, window_params = [{transform_indices = @transform_0, window_bounds = array<i64: 8, 16>}, {pipeline_mode = #tpu.pipeline_mode<synchronous>, transform_indices = @transform_1, window_bounds = array<i64: 16, 32>}, {pipeline_mode = #tpu.pipeline_mode<synchronous>, transform_indices = @transform_2, window_bounds = array<i64: 1, 32>}, {pipeline_mode = #tpu.pipeline_mode<synchronous>, transform_indices = @transform_3, window_bounds = array<i64: 1, 32>}, {pipeline_mode = #tpu.pipeline_mode<synchronous>, transform_indices = @transform_4, window_bounds = array<i64: 1, 1>}, {transform_indices = @transform_5, window_bounds = array<i64: 8, 1>}]} {
    %c0 = arith.constant 0 : index
    %c0_0 = arith.constant 0 : index
    %0 = vector.load %arg1[%c0, %c0_0] : memref<8x16xbf16, #tpu.memory_space<vmem>>, vector<8x16xbf16>
    %c0_1 = arith.constant 0 : index
    %c0_2 = arith.constant 0 : index
    %1 = vector.load %arg2[%c0_1, %c0_2] : memref<16x32xbf16, #tpu.memory_space<vmem>>, vector<16x32xbf16>
    %cst = arith.constant dense<0.000000e+00> : vector<8x32xf32>
    %2 = tpu.matmul %0, %1, %cst {dimension_numbers = #tpu.dot_dimension_numbers<[1], [0], [0], [1], [0, 0, 1, 1], [], []>} : vector<8x16xbf16>, vector<16x32xbf16>, vector<8x32xf32> -> vector<8x32xf32>
    %c0_3 = arith.constant 0 : index
    %c0_4 = arith.constant 0 : index
    %3 = vector.load %arg3[%c0_3, %c0_4] : memref<1x32xf32, #tpu.memory_space<vmem>>, vector<1x32xf32>
    %4 = vector.broadcast %3 : vector<1x32xf32> to vector<8x32xf32>
    %5 = arith.addf %2, %4 : vector<8x32xf32>
    %cst_5 = arith.constant 0.000000e+00 : f32
    %6 = vector.broadcast %cst_5 : f32 to vector<8x32xf32>
    %7 = arith.maximumf %5, %6 : vector<8x32xf32>
    %c0_6 = arith.constant 0 : index
    %c0_7 = arith.constant 0 : index
    %8 = vector.load %arg4[%c0_6, %c0_7] : memref<1x32xf32, #tpu.memory_space<vmem>>, vector<1x32xf32>
    %9 = vector.broadcast %8 : vector<1x32xf32> to vector<8x32xf32>
    %10 = arith.mulf %7, %9 : vector<8x32xf32>
    %cst_8 = arith.constant dense<0.000000e+00> : vector<8xf32>
    %11 = vector.multi_reduction <add>, %10, %cst_8 [1] : vector<8x32xf32> to vector<8xf32>
    %12 = vector.shape_cast %11 : vector<8xf32> to vector<8x1xf32>
    %c0_9 = arith.constant 0 : index
    %c0_10 = arith.constant 0 : index
    %13 = vector.load %arg5[%c0_9, %c0_10] : memref<1x1xf32, #tpu.memory_space<vmem>>, vector<1x1xf32>
    %14 = vector.broadcast %13 : vector<1x1xf32> to vector<8x1xf32>
    %15 = arith.addf %12, %14 : vector<8x1xf32>
    %cst_11 = arith.constant 0.000000e+00 : f32
    %16 = vector.broadcast %cst_11 : f32 to vector<8x1xf32>
    %17 = arith.subf %16, %15 : vector<8x1xf32>
    %18 = math.exp %17 : vector<8x1xf32>
    %cst_12 = arith.constant 1.000000e+00 : f32
    %19 = vector.broadcast %cst_12 : f32 to vector<8x1xf32>
    %20 = arith.addf %19, %18 : vector<8x1xf32>
    %21 = tpu.reciprocal %20 {approx = true} : vector<8x1xf32> -> vector<8x1xf32>
    %c0_13 = arith.constant 0 : index
    %c0_14 = arith.constant 0 : index
    %22 = vector.load %arg6[%c0_13, %c0_14] : memref<8x1xf32, #tpu.memory_space<vmem>>, vector<8x1xf32>
    tpu.vector_store %arg6[%c0_13, %c0_14], %21 {strides = array<i32>} : memref<8x1xf32, #tpu.memory_space<vmem>>, vector<8x1xf32>,
    return
  }
  func.func @transform_0(%arg0: i32) -> (i32, i32) {
    %c0_i32 = arith.constant 0 : i32
    %c0_i32_0 = arith.constant 0 : i32
    return %arg0, %c0_i32 : i32, i32
  }
  func.func @transform_1(%arg0: i32) -> (i32, i32) {
    %c0_i32 = arith.constant 0 : i32
    %c0_i32_0 = arith.constant 0 : i32
    %c0_i32_1 = arith.constant 0 : i32
    return %c0_i32, %c0_i32_0 : i32, i32
  }
  func.func @transform_2(%arg0: i32) -> (i32, i32) {
    %c0_i32 = arith.constant 0 : i32
    %c0_i32_0 = arith.constant 0 : i32
    %c0_i32_1 = arith.constant 0 : i32
    return %c0_i32, %c0_i32_0 : i32, i32
  }
  func.func @transform_3(%arg0: i32) -> (i32, i32) {
    %c0_i32 = arith.constant 0 : i32
    %c0_i32_0 = arith.constant 0 : i32
    %c0_i32_1 = arith.constant 0 : i32
    return %c0_i32, %c0_i32_0 : i32, i32
  }
  func.func @transform_4(%arg0: i32) -> (i32, i32) {
    %c0_i32 = arith.constant 0 : i32
    %c0_i32_0 = arith.constant 0 : i32
    %c0_i32_1 = arith.constant 0 : i32
    return %c0_i32, %c0_i32_0 : i32, i32
  }
  func.func @transform_5(%arg0: i32) -> (i32, i32) {
    %c0_i32 = arith.constant 0 : i32
    %c0_i32_0 = arith.constant 0 : i32
    return %arg0, %c0_i32 : i32, i32
  }
}

</mosaic_0001>

<bundles_post_ra>
// kernel: tpu_custom_call.1
= control target key start
LH: loop header
LB: loop body
LE: loop exit
PB: predicated region body
PF: predicated region fallthrough
CT: control target
= control target key end

     0   :  { %s294_s0 = inlined_call_operand.hbm [shape: bf16[8,16], index: 0, kind: input, shape index: {}]   ;;  %s295_s1 = inlined_call_operand.hbm [shape: bf16[16,32], index: 1, kind: input, shape index: {}]   ;;  %s296_s2 = inlined_call_operand.vmem [shape: f32[1,32], index: 2, kind: input, shape index: {}]   ;;  %s297_s3 = inlined_call_operand.vmem [shape: f32[1,32], index: 3, kind: input, shape index: {}]   ;;  %s298_s4 = inlined_call_operand.<no memory space> [shape: f32[1,1], index: 4, kind: input, shape index: {}]   ;;  %s299_s5 = inlined_call_operand.vmem [shape: f32[8,1], index: 5, kind: output, shape index: {}]  }
   0x1   :  { %v10_v0 = vstv %s298_s4 }
   0x2   :  { %11 = vst [vmem:[#allocation2] sm:$0x1] %v10_v0 }
   0x3   :  { %12 = vsyncpa [#allocation4], 0 }
   0x4   :  { %13 = vsyncpa [#allocation6], 0  ;;  %s215_s20 = smov [#allocation3]   ;;  %s216_s22 = smov [#allocation5]  }
   0x5   :  { %s20_s21 = sshll.u32 %s215_s20, 4  ;;  %s29_s23 = sshll.u32 %s216_s22, 4  ;;  %s21_s21 = int_to_ptr.vmem [resolvable:$true] %s20_s21  ;;  %s254_s23 = int_to_ptr.vmem [resolvable:$true] %s29_s23 }
   0x6   :  { %s167_s26 = scalar_lea.hbm %s294_s0, 64 }
   0x7   :  { %p168_p0 = scmp.ne.s32.totalorder %s294_s0, %s167_s26  ;;  %p171_p1 = scmp.lt.u32.totalorder %s167_s26, %s294_s0 }
   0x9   :  { %p173_p2 = pnand %p171_p1, %p168_p0 }
   0xb   :  { %176 = shalt.err (!%p173_p2)
}
   0xc   :  { %s177_s30 = scalar_lea.vmem %s21_s21, 64  ;;  %p182_p4 = scmp.lt.s32.totalorder %s21_s21, %s21_s21 }
   0xd   :  { %p178_p3 = scmp.ne.s32.totalorder %s21_s21, %s177_s30  ;;  %p183_p5 = scmp.lt.s32.totalorder %s177_s30, %s177_s30 }
   0xf   :  { %p184_p6 = por %p183_p5, %p182_p4 }
  0x11   :  { %p185_p7 = pnand %p184_p6, %p178_p3 }
  0x13   :  { %188 = shalt.err (!%p185_p7)
}
  0x14   :  { %23 = dma.hbm_to_vmem [thread:$0]  %s294_s0, 64, %s21_s21, [#allocation4]  }
  0x15   :  { %s189_s10 = scalar_lea.hbm %s295_s1, 128 }
  0x16   :  { %p190_p8 = scmp.ne.s32.totalorder %s295_s1, %s189_s10  ;;  %p193_p9 = scmp.lt.u32.totalorder %s189_s10, %s295_s1 }
  0x18   :  { %p195_p10 = pnand %p193_p9, %p190_p8 }
  0x1a   :  { %198 = shalt.err (!%p195_p10)
}
  0x1b   :  { %s199_s15 = scalar_lea.vmem %s254_s23, 128  ;;  %p204_p12 = scmp.lt.s32.totalorder %s254_s23, %s254_s23 }
  0x1c   :  { %p200_p11 = scmp.ne.s32.totalorder %s254_s23, %s199_s15  ;;  %p205_p13 = scmp.lt.s32.totalorder %s199_s15, %s199_s15 }
  0x1e   :  { %p206_p0 = por %p205_p13, %p204_p12 }
  0x20   :  { %p207_p1 = pnand %p206_p0, %p200_p11 }
  0x22   :  { %210 = shalt.err (!%p207_p1)
}
  0x23   :  { %s217_s0 = smov 64   ;;  %s218_s16 = smov 4  }
  0x24   :  { %35 = dma.hbm_to_vmem [thread:$0]  %s295_s1, 128, %s254_s23, [#allocation6], %s217_s0, %s217_s0, %s218_s16  }
  0x25   :  { %211 = dma.done.wait [#allocation4], 64  }
  0x26   :  { %212 = vsyncadd [#allocation4], 4294967232 }
  0x27   :  { %213 = dma.done.wait [#allocation6], 128  }
  0x28   :  { %214 = vsyncadd [#allocation6], 4294967168  ;;  %v219_v1 = vmov 0.0   ;;  %vm220_vm0 = vmmov 0   ;;  %v162_v2 = vld [vmem:[#allocation5] sm:$0xff]   ;;  %vm65_vm1 = vcmask 130048  }
  0x29   :  { %150 = vmatprep.subr.bf16.mxu0 %v219_v1  ;;  %152 = vmatprep.mubr.msk.bf16.mxu0 %vm220_vm0, %v219_v1  ;;  %v49_v3 = vld [vmem:[#allocation3] sm:$0xf]  ;;  %v143_v4 = vld [vmem:[%s296_s2] ss:$0 sm:$0xff]  ;;  %vm118_vm2 = vcmask 261120   ;;  %vm135_vm3 = vcmask 7168  }
  0x2a   :  { %151 = vmatpush3.bf16.msra.mxu0 %v162_v2  ;;  %v146_v9 = vld [vmem:[%s297_s3] ss:$0 sm:$0xff] }
  0x2b   :  { %v147_v14 = vld [vmem:[#allocation2] ss:$0 sm:$0xff] }
  0x2d   :  { %153 = vmatmul.mubr.msk.bf16.vlgmr.msra.gmra.mrb[0].mxu0 %vm65_vm1, %v49_v3 }
 0x100   :  { %v103_v5 = vpop.f32.mrb[0].mxu0 }
 0x101   :  { %v104_v6 = vadd.f32 %v143_v4, %v103_v5  ;;  %v154_v7 = vpop.f32.mrb[1].mxu0 }
 0x102   :  { %v106_v8 = vpop.f32.mrb[2].mxu0 }
 0x103   :  { %v109_v10 = vmax.f32 %v104_v6, 0.0  ;;  %v155_v11 = vpop.f32.mrb[3].mxu0 }
 0x105   :  { %v117_v12 = vmul.f32 %v146_v9, %v109_v10 }
 0x107   :  { %v119_v13 = vsel %vm118_vm2, %v117_v12, 0.0 }
 0x108   :  { %120 = vadd.xlane.f32.xlu0 %v119_v13 }
 0x195   :  { %v121_v15 = vpop.xlane.xlu0 %120 }
 0x196   :  { %v129_v16 = vadd.f32 %v147_v14, %v121_v15 }
 0x198   :  { %v130_v17 = vsub.f32 0.0, %v129_v16 }
 0x19a   :  { %v131_v18 = vmul.f32 1.442695, %v130_v17 }
 0x19c   :  { %163 = vpow2.f32 %v131_v18 }
 0x1a6   :  { %v164_v19 = vpop.eup %163 }
 0x1a7   :  { %v133_v20 = vadd.f32 1.0, %v164_v19 }
 0x1a9   :  { %165 = vrcp.f32 %v133_v20 }
 0x1b3   :  { %v166_v21 = vpop.eup %165 }
 0x1b4   :  { %136 = vst.msk [vmem:[%s299_s5] sm:$0xff] %vm135_vm3, %v166_v21 }
 0x1b5   :  { %141 = vsyncpa [#allocation4], 1 }
 0x1b6   :  { %142 = vsyncpa [#allocation6], 1 }

</bundles_post_ra>
